<compile_context>
chip_gen: v7x
topology: tpu7x:2x2x1
jax: 0.10.0
libtpu: 0.0.40
codegen_flags: <defaults>
</compile_context>

<pallas_src>
import functools

import jax
import jax.numpy as jnp
from jax import lax
from jax.experimental import pallas as pl
from jax.experimental.pallas import tpu as pltpu

_MiB = 1024 * 1024


# ---------------------------------------------------------------------------
# Tiling / VMEM budgeting helpers
# ---------------------------------------------------------------------------
def _round_up(x, m):
    return (x + m - 1) // m * m


def _padded_bytes(shape, itemsize):
    """Approximate VMEM footprint: last dim pads to 128 lanes, 2nd-last to 8 sublanes."""
    dims = list(shape)
    dims[-1] = _round_up(dims[-1], 128)
    if len(dims) >= 2:
        dims[-2] = _round_up(dims[-2], 8)
    n = 1
    for d in dims:
        n *= int(d)
    return n * itemsize


def _pick_tile(n, target, multiple=8):
    """Largest tile <= target that divides n and is a multiple of `multiple`;
    falls back to the full extent n (always a legal block shape)."""
    if n <= target:
        return n
    t = (target // multiple) * multiple
    while t >= multiple:
        if n % t == 0:
            return t
        t -= multiple
    return n


def _vmem_budget():
    """(requested vmem_limit_bytes, physical VMEM capacity) for this TPU generation."""
    try:
        cap = int(pltpu.get_tpu_info().vmem_capacity_bytes)
    except Exception:
        cap = 64 * _MiB  # conservative default (v7x-sized) if the query is unavailable
    # Leave headroom for compiler scratch / pipeline bookkeeping:
    #   128 MiB parts (v5e/v6e) -> 96 MiB requested; 64 MiB parts (v7x) -> 48 MiB.
    return min(cap * 3 // 4, 112 * _MiB), cap


def _kernel1_tile(N, D, H, hd, in_bytes, q_bytes, w_bufs, budget):
    """Token tile for the QKV projection.  The token dim is the lane dim of the
    K^T output, so prefer multiples of 128."""
    for tgt in (1024, 512, 256, 128):
        tn = _pick_tile(N, tgt, multiple=128)
        need = (2 * _padded_bytes((tn, D), in_bytes)               # x (double buffered)
                + w_bufs * 3 * _padded_bytes((D, D), in_bytes)      # resident weights
                + w_bufs * 3 * _padded_bytes((1, D), 4)             # biases
                + 2 * 2 * _padded_bytes((H, tn, hd), q_bytes)       # Q, V output blocks
                + 2 * _padded_bytes((H, hd, tn), q_bytes)           # K^T output block
                + 4 * _padded_bytes((tn, D), 4))                    # f32 q/k/v/k^T temporaries
        if need <= budget:
            return tn
    return _pick_tile(N, 128, multiple=128)


def _kernel2_tiles(N, D, H, hd, in_bytes, q_bytes, w_bufs, budget):
    """(tq, tk) for the flash-attention kernel: largest pair fitting the budget."""
    for tq_t, tk_t in ((512, 1024), (512, 512), (384, 512), (256, 512),
                       (256, 256), (128, 256), (128, 128)):
        tq = _pick_tile(N, tq_t, multiple=8)
        tk = _pick_tile(N, tk_t, multiple=128)
        need = (2 * _padded_bytes((H, tq, hd), q_bytes)             # Q blocks
                + 2 * _padded_bytes((H, hd, tk), q_bytes)           # K^T blocks
                + 2 * _padded_bytes((H, tk, hd), q_bytes)           # V blocks
                + w_bufs * (_padded_bytes((D, D), q_bytes)
                            + _padded_bytes((1, D), 4))             # resident Wproj + bias
                + 2 * _padded_bytes((tq, D), in_bytes)              # output blocks
                + 2 * _padded_bytes((H, tq), 4)                     # m, l scratch (lane-dense)
                + _padded_bytes((H, tq, hd), 4)                     # acc scratch
                + _padded_bytes((tq, D), 4)                         # head-merge scratch
                + 2 * _padded_bytes((H, tq, tk), 4)                 # S / P f32 temporaries
                + _padded_bytes((H, tq, hd), 4)                     # PV f32 temporary
                + 2 * _padded_bytes((tq, D), 4))                    # projection temporaries
        if need <= budget:
            return tq, tk
    return _pick_tile(N, 128, multiple=8), _pick_tile(N, 128, multiple=128)


# ---------------------------------------------------------------------------
# One-time capability probe: single-buffered resident weight blocks
# ---------------------------------------------------------------------------
_single_buffer_ok = None


def _single_buffered_weights_supported():
    """Probe once whether pl.Buffered(1) lowers on this jax/backend.  Probing a
    tiny throwaway kernel means the real attention kernels never sit inside a
    try/except (no silent retrace/recompile, no masked errors)."""
    global _single_buffer_ok
    if _single_buffer_ok is not None:
        return _single_buffer_ok
    if not hasattr(pl, "Buffered"):
        _single_buffer_ok = False
        return _single_buffer_ok
    try:
        def _probe(x_ref, o_ref):
            o_ref[...] = x_ref[...] + 1.0

        fn = pl.pallas_call(
            _probe,
            out_shape=jax.ShapeDtypeStruct((8, 128), jnp.float32),
            grid=(2,),
            in_specs=[pl.BlockSpec((8, 128), lambda i: (0, 0),
                                   pipeline_mode=pl.Buffered(1))],
            out_specs=pl.BlockSpec((8, 128), lambda i: (0, 0)),
        )
        jax.block_until_ready(fn(jnp.zeros((8, 128), jnp.float32)))
        _single_buffer_ok = True
    except Exception:
        _single_buffer_ok = False
    return _single_buffer_ok


def _weight_spec(shape, index_map, single_buffer):
    """Constant-index (resident) blocks: single-buffer when supported so weights
    are not duplicated in VMEM (matters under v7x's 64 MiB)."""
    if single_buffer:
        return pl.BlockSpec(shape, index_map, pipeline_mode=pl.Buffered(1))
    return pl.BlockSpec(shape, index_map)


# ---------------------------------------------------------------------------
# Kernel 1: fused QKV projection, head-major Q/V and transposed K outputs.
# ---------------------------------------------------------------------------
def _qkv_proj_kernel(x_ref, wq_ref, wk_ref, wv_ref, bq_ref, bk_ref, bv_ref,
                     q_ref, kt_ref, v_ref, *, n_heads, head_dim):
    x = x_ref[0]                                                      # (tn, D)
    # One full-width MXU matmul per projection (contraction = D, output = D),
    # f32 accumulation.  The attention scale is pre-folded into wq / bq.
    q = jnp.dot(x, wq_ref[...], preferred_element_type=jnp.float32) + bq_ref[...]
    k = jnp.dot(x, wk_ref[...], preferred_element_type=jnp.float32) + bk_ref[...]
    v = jnp.dot(x, wv_ref[...], preferred_element_type=jnp.float32) + bv_ref[...]
    # Single (tn, D) -> (D, tn) XLU transpose so every K store below is
    # lane-dense over the token dim and kernel 2 never relayouts its RHS.
    kt = k.T                                                          # (D, tn) f32
    # Head-major stores: cheap slices + stores, hidden under the MXU work.
    for h in range(n_heads):
        cols = slice(h * head_dim, (h + 1) * head_dim)
        q_ref[0, h] = q[:, cols].astype(q_ref.dtype)
        v_ref[0, h] = v[:, cols].astype(v_ref.dtype)
        kt_ref[0, h] = kt[cols, :].astype(kt_ref.dtype)
    # TODO(synk): if head_dim < 128 the Q/V stores are still sub-lane-tile
    # (masked) stores; packing two heads per 128-lane tile would make them
    # dense too.


# ---------------------------------------------------------------------------
# Kernel 2: flash-style attention (online softmax over KV tiles) fused with
# the output projection.
# ---------------------------------------------------------------------------
def _flash_attn_proj_kernel(q_ref, kt_ref, v_ref, wp_ref, bp_ref, o_ref,
                            m_scr, l_scr, acc_scr, w2d_scr, *, n_heads, head_dim):
    ki = pl.program_id(2)

    @pl.when(ki == 0)
    def _init():
        m_scr[...] = jnp.full_like(m_scr, -jnp.inf)
        l_scr[...] = jnp.zeros_like(l_scr)
        acc_scr[...] = jnp.zeros_like(acc_scr)

    q = q_ref[0]                                    # (H, tq, hd), scale pre-folded
    kt = kt_ref[0]                                  # (H, hd, tk)  (K^T layout)
    v = v_ref[0]                                    # (H, tk, hd)

    # Scores: canonical (tq, hd) x (hd, tk) contraction, batched over heads.
    s = lax.dot_general(q, kt, (((2,), (1,)), ((0,), (0,))),
                        preferred_element_type=jnp.float32)           # (H, tq, tk)

    m_prev = m_scr[...]                                               # (H, tq)
    m_new = jnp.maximum(m_prev, jnp.max(s, axis=-1))                  # (H, tq)
    alpha = jnp.exp(m_prev - m_new)                                   # (H, tq)
    p = jnp.exp(s - m_new[..., None])                                 # (H, tq, tk) f32
    l_scr[...] = alpha * l_scr[...] + jnp.sum(p, axis=-1)
    pv = lax.dot_general(p.astype(v.dtype), v, (((2,), (1,)), ((0,), (0,))),
                         preferred_element_type=jnp.float32)          # (H, tq, hd)
    acc_scr[...] = alpha[..., None] * acc_scr[...] + pv
    m_scr[...] = m_new

    @pl.when(ki == pl.num_programs(2) - 1)
    def _finalize():
        inv_l = pl.reciprocal(l_scr[...], approx=True)                # EUP slot
        weighted = acc_scr[...] * inv_l[..., None]                    # (H, tq, hd) f32
        # Merge the heads along lanes once per q-tile so the fused output
        # projection is ONE full-width (tq, D) x (D, D) MXU matmul
        # (contraction = D, not H skinny head_dim-deep matmuls).
        for h in range(n_heads):
            w2d_scr[:, h * head_dim:(h + 1) * head_dim] = weighted[h]
        out = jnp.dot(w2d_scr[...].astype(wp_ref.dtype), wp_ref[...],
                      preferred_element_type=jnp.float32) + bp_ref[...]
        o_ref[0] = out.astype(o_ref.dtype)                            # lane-dense (tq, D)


# ---------------------------------------------------------------------------
# Host-side wrapper
# ---------------------------------------------------------------------------
def attention_forward(x, wqkv, bqkv, wproj, bproj, *, n_heads,
                      qkv_dtype=jnp.bfloat16):
    """LRformer Attention forward: proj(softmax(q k^T / sqrt(hd)) v).

    attn_p == proj_p == 0.0 so both dropouts are the identity; `alpha` is unused
    in the reference forward.  Q/K/V intermediates are stored in `qkv_dtype`
    (bf16 by default) with f32 MXU accumulation everywhere.
    """
    B, N, D = x.shape
    H = int(n_heads)
    hd = D // H
    assert hd * H == D, "dim must be divisible by n_heads"
    in_dtype = x.dtype
    qkv_dtype = jnp.dtype(qkv_dtype)
    scale = hd ** (-0.5)

    # ---- weight / bias layout plumbing (plain XLA on weights only, once) ----
    w3 = wqkv.astype(jnp.float32).reshape(D, 3, D)          # columns [q | k | v]
    wq = (w3[:, 0] * scale).astype(in_dtype)                # scale folded into Wq/bq
    wk = w3[:, 1].astype(in_dtype)
    wv = w3[:, 2].astype(in_dtype)
    b3 = bqkv.astype(jnp.float32).reshape(3, 1, D)
    bq = b3[0] * scale                                      # biases stay f32
    bk = b3[1]
    bv = b3[2]
    wp = wproj.astype(qkv_dtype)                            # (D, D), rows [h0|h1|...]
    bp = bproj.astype(jnp.float32).reshape(1, D)

    in_bytes = jnp.dtype(in_dtype).itemsize
    q_bytes = qkv_dtype.itemsize
    vmem_limit, _ = _vmem_budget()
    budget = int(vmem_limit * 0.8)                          # headroom for compiler scratch

    single_buffer = _single_buffered_weights_supported()
    w_bufs = 1 if single_buffer else 2

    tn = _kernel1_tile(N, D, H, hd, in_bytes, q_bytes, w_bufs, budget)
    tq, tk = _kernel2_tiles(N, D, H, hd, in_bytes, q_bytes, w_bufs, budget)

    def wspec(shape, index_map):
        return _weight_spec(shape, index_map, single_buffer)

    # ---------------- kernel 1: fused QKV projection ------------------------
    qkv_cost = pl.CostEstimate(
        flops=6 * B * N * D * D,
        transcendentals=0,
        bytes_accessed=int(B * N * D * in_bytes + 3 * D * D * in_bytes
                           + 3 * D * 4 + 3 * B * N * D * q_bytes))

    qv_shape = jax.ShapeDtypeStruct((B, H, N, hd), qkv_dtype)
    kt_shape = jax.ShapeDtypeStruct((B, H, hd, N), qkv_dtype)

    q_hm, kt_hm, v_hm = pl.pallas_call(
        functools.partial(_qkv_proj_kernel, n_heads=H, head_dim=hd),
        out_shape=(qv_shape, kt_shape, qv_shape),
        grid_spec=pltpu.PrefetchScalarGridSpec(
            num_scalar_prefetch=0,
            grid=(B, N // tn),
            in_specs=[
                pl.BlockSpec((1, tn, D), lambda b, i: (b, i, 0)),
                wspec((D, D), lambda b, i: (0, 0)),
                wspec((D, D), lambda b, i: (0, 0)),
                wspec((D, D), lambda b, i: (0, 0)),
                wspec((1, D), lambda b, i: (0, 0)),
                wspec((1, D), lambda b, i: (0, 0)),
                wspec((1, D), lambda b, i: (0, 0)),
            ],
            out_specs=[
                pl.BlockSpec((1, H, tn, hd), lambda b, i: (b, 0, i, 0)),
                pl.BlockSpec((1, H, hd, tn), lambda b, i: (b, 0, 0, i)),
                pl.BlockSpec((1, H, tn, hd), lambda b, i: (b, 0, i, 0)),
            ],
        ),
        compiler_params=pltpu.CompilerParams(
            dimension_semantics=("parallel", "parallel"),
            vmem_limit_bytes=vmem_limit),
        cost_estimate=qkv_cost,
    )(x, wq, wk, wv, bq, bk, bv)

    # ------------- kernel 2: flash attention + fused output projection ------
    attn_cost = pl.CostEstimate(
        flops=4 * B * N * N * D + 2 * B * N * D * D,
        transcendentals=B * H * N * N,
        bytes_accessed=int(3 * B * N * D * q_bytes + D * D * q_bytes + D * 4
                           + B * N * D * in_bytes))

    out = pl.pallas_call(
        functools.partial(_flash_attn_proj_kernel, n_heads=H, head_dim=hd),
        out_shape=jax.ShapeDtypeStruct((B, N, D), in_dtype),
        grid_spec=pltpu.PrefetchScalarGridSpec(
            num_scalar_prefetch=0,
            grid=(B, N // tq, N // tk),
            in_specs=[
                pl.BlockSpec((1, H, tq, hd), lambda b, qi, ki: (b, 0, qi, 0)),
                pl.BlockSpec((1, H, hd, tk), lambda b, qi, ki: (b, 0, 0, ki)),
                pl.BlockSpec((1, H, tk, hd), lambda b, qi, ki: (b, 0, ki, 0)),
                wspec((D, D), lambda b, qi, ki: (0, 0)),
                wspec((1, D), lambda b, qi, ki: (0, 0)),
            ],
            out_specs=pl.BlockSpec((1, tq, D), lambda b, qi, ki: (b, qi, 0)),
            scratch_shapes=[
                pltpu.VMEM((H, tq), jnp.float32),       # running max  (lane-dense)
                pltpu.VMEM((H, tq), jnp.float32),       # running sum  (lane-dense)
                pltpu.VMEM((H, tq, hd), jnp.float32),   # running weighted accumulator
                pltpu.VMEM((tq, D), jnp.float32),       # head-merge buffer for the projection
            ],
        ),
        compiler_params=pltpu.CompilerParams(
            dimension_semantics=("parallel", "parallel", "arbitrary"),
            vmem_limit_bytes=vmem_limit),
        cost_estimate=attn_cost,
    )(q_hm, kt_hm, v_hm, wp, bp)
    return out


# ---------------------------------------------------------------------------
# Pure-JAX reference mirroring the PyTorch forward pass
# ---------------------------------------------------------------------------
def attention_reference(x, wqkv, bqkv, wproj, bproj, *, n_heads, qkv_dtype=None):
    B, N, D = x.shape
    hd = D // n_heads
    scale = hd ** (-0.5)
    qkv = x.astype(jnp.float32) @ wqkv.astype(jnp.float32) + bqkv.astype(jnp.float32)
    qkv = qkv.reshape(B, N, 3, n_heads, hd).transpose(2, 0, 3, 1, 4)
    q, k, v = qkv[0] * scale, qkv[1], qkv[2]                  # (B, H, N, hd)
    if qkv_dtype is not None:                                 # mirror the kernel's bf16 storage
        q = q.astype(qkv_dtype).astype(jnp.float32)
        k = k.astype(qkv_dtype).astype(jnp.float32)
        v = v.astype(qkv_dtype).astype(jnp.float32)
    s = jnp.einsum('bhqd,bhkd->bhqk', q, k)
    attn = jax.nn.softmax(s, axis=-1)
    weighted = jnp.einsum('bhqk,bhkd->bhqd', attn, v)
    weighted = weighted.transpose(0, 2, 1, 3).reshape(B, N, D)
    out = weighted @ wproj.astype(jnp.float32) + bproj.astype(jnp.float32)
    return out.astype(x.dtype)


if __name__ == "__main__":
    B, N, D, H = 2, 8, 32, 4

    key = jax.random.PRNGKey(0)
    kx, kw1, kb1, kw2, kb2 = jax.random.split(key, 5)

    x = jax.random.normal(kx, (B, N, D), dtype=jnp.float32)
    wqkv = jax.random.normal(kw1, (D, 3 * D), dtype=jnp.float32) * 0.05
    bqkv = jax.random.normal(kb1, (3 * D,), dtype=jnp.float32) * 0.05
    wproj = jax.random.normal(kw2, (D, D), dtype=jnp.float32) * 0.05
    bproj = jax.random.normal(kb2, (D,), dtype=jnp.float32) * 0.05

    out = attention_forward(x, wqkv, bqkv, wproj, bproj, n_heads=H)
    out = jax.block_until_ready(out)
    assert out.shape == (B, N, D)

    # Tight check vs a reference that mirrors the kernel's bf16 Q/K/V storage;
    # looser check vs the pure-f32 PyTorch-equivalent reference (bf16
    # intermediates + approx reciprocal account for the tolerance).
    ref_matched = attention_reference(x, wqkv, bqkv, wproj, bproj, n_heads=H,
                                      qkv_dtype=jnp.bfloat16)
    ref_f32 = attention_reference(x, wqkv, bqkv, wproj, bproj, n_heads=H)
    err_m = float(jnp.max(jnp.abs(out - ref_matched)))
    err_f = float(jnp.max(jnp.abs(out - ref_f32)))
    assert err_m <= 3e-3, f"mismatch vs bf16-matched reference (max abs err {err_m})"
    assert err_f <= 1.5e-2, f"mismatch vs f32 reference (max abs err {err_f})"
    print("KERNEL_OK")
</pallas_src>

<mosaic_0001>
module attributes {stable_mosaic.version = 11 : i64} {
  func.func @_probe(%arg0: i32, %arg1: memref<8x128xf32, #tpu.memory_space<vmem>>, %arg2: memref<8x128xf32, #tpu.memory_space<vmem>>) attributes {dimension_semantics = [#tpu.dimension_semantics<arbitrary>], iteration_bounds = array<i64: 2>, scalar_prefetch = 0 : i64, scratch_operands = 0 : i64, tpu.core_type = #tpu.core_type<tc>, window_params = [{pipeline_mode = #tpu.pipeline_mode<synchronous>, transform_indices = @transform_0, window_bounds = array<i64: 8, 128>}, {pipeline_mode = #tpu.pipeline_mode<synchronous>, transform_indices = @transform_1, window_bounds = array<i64: 8, 128>}]} {
    %c0 = arith.constant 0 : index
    %c0_0 = arith.constant 0 : index
    %0 = vector.load %arg1[%c0, %c0_0] : memref<8x128xf32, #tpu.memory_space<vmem>>, vector<8x128xf32>
    %cst = arith.constant 1.000000e+00 : f32
    %1 = vector.broadcast %cst : f32 to vector<8x128xf32>
    %2 = arith.addf %0, %1 : vector<8x128xf32>
    %c0_1 = arith.constant 0 : index
    %c0_2 = arith.constant 0 : index
    %3 = vector.load %arg2[%c0_1, %c0_2] : memref<8x128xf32, #tpu.memory_space<vmem>>, vector<8x128xf32>
    tpu.vector_store %arg2[%c0_1, %c0_2], %2 {strides = array<i32>} : memref<8x128xf32, #tpu.memory_space<vmem>>, vector<8x128xf32>,
    return
  }
  func.func @transform_0(%arg0: i32) -> (i32, i32) {
    %c0_i32 = arith.constant 0 : i32
    %c0_i32_0 = arith.constant 0 : i32
    %c0_i32_1 = arith.constant 0 : i32
    return %c0_i32, %c0_i32_0 : i32, i32
  }
  func.func @transform_1(%arg0: i32) -> (i32, i32) {
    %c0_i32 = arith.constant 0 : i32
    %c0_i32_0 = arith.constant 0 : i32
    %c0_i32_1 = arith.constant 0 : i32
    return %c0_i32, %c0_i32_0 : i32, i32
  }
}

module attributes {stable_mosaic.version = 11 : i64} {
  func.func @_qkv_proj_kernel(%arg0: i32, %arg1: i32, %arg2: memref<1x8x32xf32, #tpu.memory_space<vmem>>, %arg3: memref<32x32xf32, #tpu.memory_space<vmem>>, %arg4: memref<32x32xf32, #tpu.memory_space<vmem>>, %arg5: memref<32x32xf32, #tpu.memory_space<vmem>>, %arg6: memref<1x32xf32, #tpu.memory_space<vmem>>, %arg7: memref<1x32xf32, #tpu.memory_space<vmem>>, %arg8: memref<1x32xf32, #tpu.memory_space<vmem>>, %arg9: memref<1x4x8x8xbf16, #tpu.memory_space<vmem>>, %arg10: memref<1x4x8x8xbf16, #tpu.memory_space<vmem>>, %arg11: memref<1x4x8x8xbf16, #tpu.memory_space<vmem>>) attributes {dimension_semantics = [#tpu.dimension_semantics<parallel>, #tpu.dimension_semantics<parallel>], iteration_bounds = array<i64: 2, 1>, scalar_prefetch = 0 : i64, scratch_operands = 0 : i64, tpu.core_type = #tpu.core_type<tc>, window_params = [{transform_indices = @transform_0, window_bounds = array<i64: 1, 8, 32>}, {pipeline_mode = #tpu.pipeline_mode<synchronous>, transform_indices = @transform_1, window_bounds = array<i64: 32, 32>}, {pipeline_mode = #tpu.pipeline_mode<synchronous>, transform_indices = @transform_2, window_bounds = array<i64: 32, 32>}, {pipeline_mode = #tpu.pipeline_mode<synchronous>, transform_indices = @transform_3, window_bounds = array<i64: 32, 32>}, {pipeline_mode = #tpu.pipeline_mode<synchronous>, transform_indices = @transform_4, window_bounds = array<i64: 1, 32>}, {pipeline_mode = #tpu.pipeline_mode<synchronous>, transform_indices = @transform_5, window_bounds = array<i64: 1, 32>}, {pipeline_mode = #tpu.pipeline_mode<synchronous>, transform_indices = @transform_6, window_bounds = array<i64: 1, 32>}, {transform_indices = @transform_7, window_bounds = array<i64: 1, 4, 8, 8>}, {transform_indices = @transform_8, window_bounds = array<i64: 1, 4, 8, 8>}, {transform_indices = @transform_9, window_bounds = array<i64: 1, 4, 8, 8>}]} {
    %c0 = arith.constant 0 : index
    %c0_0 = arith.constant 0 : index
    %c0_1 = arith.constant 0 : index
    %0 = vector.load %arg2[%c0, %c0_0, %c0_1] : memref<1x8x32xf32, #tpu.memory_space<vmem>>, vector<1x8x32xf32>
    %1 = vector.shape_cast %0 : vector<1x8x32xf32> to vector<8x32xf32>
    %c0_2 = arith.constant 0 : index
    %c0_3 = arith.constant 0 : index
    %2 = vector.load %arg3[%c0_2, %c0_3] : memref<32x32xf32, #tpu.memory_space<vmem>>, vector<32x32xf32>
    %cst = arith.constant dense<0.000000e+00> : vector<8x32xf32>
    %3 = tpu.matmul %1, %2, %cst {dimension_numbers = #tpu.dot_dimension_numbers<[1], [0], [0], [1], [0, 0, 1, 1], [], []>} : vector<8x32xf32>, vector<32x32xf32>, vector<8x32xf32> -> vector<8x32xf32>
    %c0_4 = arith.constant 0 : index
    %c0_5 = arith.constant 0 : index
    %4 = vector.load %arg6[%c0_4, %c0_5] : memref<1x32xf32, #tpu.memory_space<vmem>>, vector<1x32xf32>
    %5 = vector.broadcast %4 : vector<1x32xf32> to vector<8x32xf32>
    %6 = arith.addf %3, %5 : vector<8x32xf32>
    %c0_6 = arith.constant 0 : index
    %c0_7 = arith.constant 0 : index
    %7 = vector.load %arg4[%c0_6, %c0_7] : memref<32x32xf32, #tpu.memory_space<vmem>>, vector<32x32xf32>
    %cst_8 = arith.constant dense<0.000000e+00> : vector<8x32xf32>
    %8 = tpu.matmul %1, %7, %cst_8 {dimension_numbers = #tpu.dot_dimension_numbers<[1], [0], [0], [1], [0, 0, 1, 1], [], []>} : vector<8x32xf32>, vector<32x32xf32>, vector<8x32xf32> -> vector<8x32xf32>
    %c0_9 = arith.constant 0 : index
    %c0_10 = arith.constant 0 : index
    %9 = vector.load %arg7[%c0_9, %c0_10] : memref<1x32xf32, #tpu.memory_space<vmem>>, vector<1x32xf32>
    %10 = vector.broadcast %9 : vector<1x32xf32> to vector<8x32xf32>
    %11 = arith.addf %8, %10 : vector<8x32xf32>
    %c0_11 = arith.constant 0 : index
    %c0_12 = arith.constant 0 : index
    %12 = vector.load %arg5[%c0_11, %c0_12] : memref<32x32xf32, #tpu.memory_space<vmem>>, vector<32x32xf32>
    %cst_13 = arith.constant dense<0.000000e+00> : vector<8x32xf32>
    %13 = tpu.matmul %1, %12, %cst_13 {dimension_numbers = #tpu.dot_dimension_numbers<[1], [0], [0], [1], [0, 0, 1, 1], [], []>} : vector<8x32xf32>, vector<32x32xf32>, vector<8x32xf32> -> vector<8x32xf32>
    %c0_14 = arith.constant 0 : index
    %c0_15 = arith.constant 0 : index
    %14 = vector.load %arg8[%c0_14, %c0_15] : memref<1x32xf32, #tpu.memory_space<vmem>>, vector<1x32xf32>
    %15 = vector.broadcast %14 : vector<1x32xf32> to vector<8x32xf32>
    %16 = arith.addf %13, %15 : vector<8x32xf32>
    %17 = tpu.transpose %11, [1, 0] : vector<8x32xf32> -> vector<32x8xf32>
    %18 = vector.extract_strided_slice %6 {offsets = [0, 0], sizes = [8, 8], strides = [1, 1]} : vector<8x32xf32> to vector<8x8xf32>
    %19 = arith.truncf %18 : vector<8x8xf32> to vector<8x8xbf16>
    %c0_16 = arith.constant 0 : index
    %c0_17 = arith.constant 0 : index
    %c0_18 = arith.constant 0 : index
    %c0_19 = arith.constant 0 : index
    %20 = vector.load %arg9[%c0_16, %c0_17, %c0_18, %c0_19] : memref<1x4x8x8xbf16, #tpu.memory_space<vmem>>, vector<1x1x8x8xbf16>
    %21 = vector.shape_cast %20 : vector<1x1x8x8xbf16> to vector<8x8xbf16>
    %22 = vector.shape_cast %19 : vector<8x8xbf16> to vector<1x1x8x8xbf16>
    tpu.vector_store %arg9[%c0_16, %c0_17, %c0_18, %c0_19], %22 {strides = array<i32>} : memref<1x4x8x8xbf16, #tpu.memory_space<vmem>>, vector<1x1x8x8xbf16>,
    %23 = vector.extract_strided_slice %16 {offsets = [0, 0], sizes = [8, 8], strides = [1, 1]} : vector<8x32xf32> to vector<8x8xf32>
    %24 = arith.truncf %23 : vector<8x8xf32> to vector<8x8xbf16>
    %c0_20 = arith.constant 0 : index
    %c0_21 = arith.constant 0 : index
    %c0_22 = arith.constant 0 : index
    %c0_23 = arith.constant 0 : index
    %25 = vector.load %arg11[%c0_20, %c0_21, %c0_22, %c0_23] : memref<1x4x8x8xbf16, #tpu.memory_space<vmem>>, vector<1x1x8x8xbf16>
    %26 = vector.shape_cast %25 : vector<1x1x8x8xbf16> to vector<8x8xbf16>
    %27 = vector.shape_cast %24 : vector<8x8xbf16> to vector<1x1x8x8xbf16>
    tpu.vector_store %arg11[%c0_20, %c0_21, %c0_22, %c0_23], %27 {strides = array<i32>} : memref<1x4x8x8xbf16, #tpu.memory_space<vmem>>, vector<1x1x8x8xbf16>,
    %28 = vector.extract_strided_slice %17 {offsets = [0, 0], sizes = [8, 8], strides = [1, 1]} : vector<32x8xf32> to vector<8x8xf32>
    %29 = arith.truncf %28 : vector<8x8xf32> to vector<8x8xbf16>
    %c0_24 = arith.constant 0 : index
    %c0_25 = arith.constant 0 : index
    %c0_26 = arith.constant 0 : index
    %c0_27 = arith.constant 0 : index
    %30 = vector.load %arg10[%c0_24, %c0_25, %c0_26, %c0_27] : memref<1x4x8x8xbf16, #tpu.memory_space<vmem>>, vector<1x1x8x8xbf16>
    %31 = vector.shape_cast %30 : vector<1x1x8x8xbf16> to vector<8x8xbf16>
    %32 = vector.shape_cast %29 : vector<8x8xbf16> to vector<1x1x8x8xbf16>
    tpu.vector_store %arg10[%c0_24, %c0_25, %c0_26, %c0_27], %32 {strides = array<i32>} : memref<1x4x8x8xbf16, #tpu.memory_space<vmem>>, vector<1x1x8x8xbf16>,
    %33 = vector.extract_strided_slice %6 {offsets = [0, 8], sizes = [8, 8], strides = [1, 1]} : vector<8x32xf32> to vector<8x8xf32>
    %34 = arith.truncf %33 : vector<8x8xf32> to vector<8x8xbf16>
    %c0_28 = arith.constant 0 : index
    %c1 = arith.constant 1 : index
    %c0_29 = arith.constant 0 : index
    %c0_30 = arith.constant 0 : index
    %35 = vector.load %arg9[%c0_28, %c1, %c0_29, %c0_30] : memref<1x4x8x8xbf16, #tpu.memory_space<vmem>>, vector<1x1x8x8xbf16>
    %36 = vector.shape_cast %35 : vector<1x1x8x8xbf16> to vector<8x8xbf16>
    %37 = vector.shape_cast %34 : vector<8x8xbf16> to vector<1x1x8x8xbf16>
    tpu.vector_store %arg9[%c0_28, %c1, %c0_29, %c0_30], %37 {strides = array<i32>} : memref<1x4x8x8xbf16, #tpu.memory_space<vmem>>, vector<1x1x8x8xbf16>,
    %38 = vector.extract_strided_slice %16 {offsets = [0, 8], sizes = [8, 8], strides = [1, 1]} : vector<8x32xf32> to vector<8x8xf32>
    %39 = arith.truncf %38 : vector<8x8xf32> to vector<8x8xbf16>
    %c0_31 = arith.constant 0 : index
    %c1_32 = arith.constant 1 : index
    %c0_33 = arith.constant 0 : index
    %c0_34 = arith.constant 0 : index
    %40 = vector.load %arg11[%c0_31, %c1_32, %c0_33, %c0_34] : memref<1x4x8x8xbf16, #tpu.memory_space<vmem>>, vector<1x1x8x8xbf16>
    %41 = vector.shape_cast %40 : vector<1x1x8x8xbf16> to vector<8x8xbf16>
    %42 = vector.shape_cast %39 : vector<8x8xbf16> to vector<1x1x8x8xbf16>
    tpu.vector_store %arg11[%c0_31, %c1_32, %c0_33, %c0_34], %42 {strides = array<i32>} : memref<1x4x8x8xbf16, #tpu.memory_space<vmem>>, vector<1x1x8x8xbf16>,
    %43 = vector.extract_strided_slice %17 {offsets = [8, 0], sizes = [8, 8], strides = [1, 1]} : vector<32x8xf32> to vector<8x8xf32>
    %44 = arith.truncf %43 : vector<8x8xf32> to vector<8x8xbf16>
    %c0_35 = arith.constant 0 : index
    %c1_36 = arith.constant 1 : index
    %c0_37 = arith.constant 0 : index
    %c0_38 = arith.constant 0 : index
    %45 = vector.load %arg10[%c0_35, %c1_36, %c0_37, %c0_38] : memref<1x4x8x8xbf16, #tpu.memory_space<vmem>>, vector<1x1x8x8xbf16>
    %46 = vector.shape_cast %45 : vector<1x1x8x8xbf16> to vector<8x8xbf16>
    %47 = vector.shape_cast %44 : vector<8x8xbf16> to vector<1x1x8x8xbf16>
    tpu.vector_store %arg10[%c0_35, %c1_36, %c0_37, %c0_38], %47 {strides = array<i32>} : memref<1x4x8x8xbf16, #tpu.memory_space<vmem>>, vector<1x1x8x8xbf16>,
    %48 = vector.extract_strided_slice %6 {offsets = [0, 16], sizes = [8, 8], strides = [1, 1]} : vector<8x32xf32> to vector<8x8xf32>
    %49 = arith.truncf %48 : vector<8x8xf32> to vector<8x8xbf16>
    %c0_39 = arith.constant 0 : index
    %c2 = arith.constant 2 : index
    %c0_40 = arith.constant 0 : index
    %c0_41 = arith.constant 0 : index
    %50 = vector.load %arg9[%c0_39, %c2, %c0_40, %c0_41] : memref<1x4x8x8xbf16, #tpu.memory_space<vmem>>, vector<1x1x8x8xbf16>
    %51 = vector.shape_cast %50 : vector<1x1x8x8xbf16> to vector<8x8xbf16>
    %52 = vector.shape_cast %49 : vector<8x8xbf16> to vector<1x1x8x8xbf16>
    tpu.vector_store %arg9[%c0_39, %c2, %c0_40, %c0_41], %52 {strides = array<i32>} : memref<1x4x8x8xbf16, #tpu.memory_space<vmem>>, vector<1x1x8x8xbf16>,
    %53 = vector.extract_strided_slice %16 {offsets = [0, 16], sizes = [8, 8], strides = [1, 1]} : vector<8x32xf32> to vector<8x8xf32>
    %54 = arith.truncf %53 : vector<8x8xf32> to vector<8x8xbf16>
    %c0_42 = arith.constant 0 : index
    %c2_43 = arith.constant 2 : index
    %c0_44 = arith.constant 0 : index
    %c0_45 = arith.constant 0 : index
    %55 = vector.load %arg11[%c0_42, %c2_43, %c0_44, %c0_45] : memref<1x4x8x8xbf16, #tpu.memory_space<vmem>>, vector<1x1x8x8xbf16>
    %56 = vector.shape_cast %55 : vector<1x1x8x8xbf16> to vector<8x8xbf16>
    %57 = vector.shape_cast %54 : vector<8x8xbf16> to vector<1x1x8x8xbf16>
    tpu.vector_store %arg11[%c0_42, %c2_43, %c0_44, %c0_45], %57 {strides = array<i32>} : memref<1x4x8x8xbf16, #tpu.memory_space<vmem>>, vector<1x1x8x8xbf16>,
    %58 = vector.extract_strided_slice %17 {offsets = [16, 0], sizes = [8, 8], strides = [1, 1]} : vector<32x8xf32> to vector<8x8xf32>
    %59 = arith.truncf %58 : vector<8x8xf32> to vector<8x8xbf16>
    %c0_46 = arith.constant 0 : index
    %c2_47 = arith.constant 2 : index
    %c0_48 = arith.constant 0 : index
    %c0_49 = arith.constant 0 : index
    %60 = vector.load %arg10[%c0_46, %c2_47, %c0_48, %c0_49] : memref<1x4x8x8xbf16, #tpu.memory_space<vmem>>, vector<1x1x8x8xbf16>
    %61 = vector.shape_cast %60 : vector<1x1x8x8xbf16> to vector<8x8xbf16>
    %62 = vector.shape_cast %59 : vector<8x8xbf16> to vector<1x1x8x8xbf16>
    tpu.vector_store %arg10[%c0_46, %c2_47, %c0_48, %c0_49], %62 {strides = array<i32>} : memref<1x4x8x8xbf16, #tpu.memory_space<vmem>>, vector<1x1x8x8xbf16>,
    %63 = vector.extract_strided_slice %6 {offsets = [0, 24], sizes = [8, 8], strides = [1, 1]} : vector<8x32xf32> to vector<8x8xf32>
    %64 = arith.truncf %63 : vector<8x8xf32> to vector<8x8xbf16>
    %c0_50 = arith.constant 0 : index
    %c3 = arith.constant 3 : index
    %c0_51 = arith.constant 0 : index
    %c0_52 = arith.constant 0 : index
    %65 = vector.load %arg9[%c0_50, %c3, %c0_51, %c0_52] : memref<1x4x8x8xbf16, #tpu.memory_space<vmem>>, vector<1x1x8x8xbf16>
    %66 = vector.shape_cast %65 : vector<1x1x8x8xbf16> to vector<8x8xbf16>
    %67 = vector.shape_cast %64 : vector<8x8xbf16> to vector<1x1x8x8xbf16>
    tpu.vector_store %arg9[%c0_50, %c3, %c0_51, %c0_52], %67 {strides = array<i32>} : memref<1x4x8x8xbf16, #tpu.memory_space<vmem>>, vector<1x1x8x8xbf16>,
    %68 = vector.extract_strided_slice %16 {offsets = [0, 24], sizes = [8, 8], strides = [1, 1]} : vector<8x32xf32> to vector<8x8xf32>
    %69 = arith.truncf %68 : vector<8x8xf32> to vector<8x8xbf16>
    %c0_53 = arith.constant 0 : index
    %c3_54 = arith.constant 3 : index
    %c0_55 = arith.constant 0 : index
    %c0_56 = arith.constant 0 : index
    %70 = vector.load %arg11[%c0_53, %c3_54, %c0_55, %c0_56] : memref<1x4x8x8xbf16, #tpu.memory_space<vmem>>, vector<1x1x8x8xbf16>
    %71 = vector.shape_cast %70 : vector<1x1x8x8xbf16> to vector<8x8xbf16>
    %72 = vector.shape_cast %69 : vector<8x8xbf16> to vector<1x1x8x8xbf16>
    tpu.vector_store %arg11[%c0_53, %c3_54, %c0_55, %c0_56], %72 {strides = array<i32>} : memref<1x4x8x8xbf16, #tpu.memory_space<vmem>>, vector<1x1x8x8xbf16>,
    %73 = vector.extract_strided_slice %17 {offsets = [24, 0], sizes = [8, 8], strides = [1, 1]} : vector<32x8xf32> to vector<8x8xf32>
    %74 = arith.truncf %73 : vector<8x8xf32> to vector<8x8xbf16>
    %c0_57 = arith.constant 0 : index
    %c3_58 = arith.constant 3 : index
    %c0_59 = arith.constant 0 : index
    %c0_60 = arith.constant 0 : index
    %75 = vector.load %arg10[%c0_57, %c3_58, %c0_59, %c0_60] : memref<1x4x8x8xbf16, #tpu.memory_space<vmem>>, vector<1x1x8x8xbf16>
    %76 = vector.shape_cast %75 : vector<1x1x8x8xbf16> to vector<8x8xbf16>
    %77 = vector.shape_cast %74 : vector<8x8xbf16> to vector<1x1x8x8xbf16>
    tpu.vector_store %arg10[%c0_57, %c3_58, %c0_59, %c0_60], %77 {strides = array<i32>} : memref<1x4x8x8xbf16, #tpu.memory_space<vmem>>, vector<1x1x8x8xbf16>,
    return
  }
  func.func @transform_0(%arg0: i32, %arg1: i32) -> (i32, i32, i32) {
    %c0_i32 = arith.constant 0 : i32
    %c0_i32_0 = arith.constant 0 : i32
    return %arg0, %arg1, %c0_i32 : i32, i32, i32
  }
  func.func @transform_1(%arg0: i32, %arg1: i32) -> (i32, i32) {
    %c0_i32 = arith.constant 0 : i32
    %c0_i32_0 = arith.constant 0 : i32
    %c0_i32_1 = arith.constant 0 : i32
    return %c0_i32, %c0_i32_0 : i32, i32
  }
  func.func @transform_2(%arg0: i32, %arg1: i32) -> (i32, i32) {
    %c0_i32 = arith.constant 0 : i32
    %c0_i32_0 = arith.constant 0 : i32
    %c0_i32_1 = arith.constant 0 : i32
    return %c0_i32, %c0_i32_0 : i32, i32
  }
  func.func @transform_3(%arg0: i32, %arg1: i32) -> (i32, i32) {
    %c0_i32 = arith.constant 0 : i32
    %c0_i32_0 = arith.constant 0 : i32
    %c0_i32_1 = arith.constant 0 : i32
    return %c0_i32, %c0_i32_0 : i32, i32
  }
  func.func @transform_4(%arg0: i32, %arg1: i32) -> (i32, i32) {
    %c0_i32 = arith.constant 0 : i32
    %c0_i32_0 = arith.constant 0 : i32
    %c0_i32_1 = arith.constant 0 : i32
    return %c0_i32, %c0_i32_0 : i32, i32
  }
  func.func @transform_5(%arg0: i32, %arg1: i32) -> (i32, i32) {
    %c0_i32 = arith.constant 0 : i32
    %c0_i32_0 = arith.constant 0 : i32
    %c0_i32_1 = arith.constant 0 : i32
    return %c0_i32, %c0_i32_0 : i32, i32
  }
  func.func @transform_6(%arg0: i32, %arg1: i32) -> (i32, i32) {
    %c0_i32 = arith.constant 0 : i32
    %c0_i32_0 = arith.constant 0 : i32
    %c0_i32_1 = arith.constant 0 : i32
    return %c0_i32, %c0_i32_0 : i32, i32
  }
  func.func @transform_7(%arg0: i32, %arg1: i32) -> (i32, i32, i32, i32) {
    %c0_i32 = arith.constant 0 : i32
    %c0_i32_0 = arith.constant 0 : i32
    %c0_i32_1 = arith.constant 0 : i32
    return %arg0, %c0_i32, %arg1, %c0_i32_0 : i32, i32, i32, i32
  }
  func.func @transform_8(%arg0: i32, %arg1: i32) -> (i32, i32, i32, i32) {
    %c0_i32 = arith.constant 0 : i32
    %c0_i32_0 = arith.constant 0 : i32
    %c0_i32_1 = arith.constant 0 : i32
    return %arg0, %c0_i32, %c0_i32_0, %arg1 : i32, i32, i32, i32
  }
  func.func @transform_9(%arg0: i32, %arg1: i32) -> (i32, i32, i32, i32) {
    %c0_i32 = arith.constant 0 : i32
    %c0_i32_0 = arith.constant 0 : i32
    %c0_i32_1 = arith.constant 0 : i32
    return %arg0, %c0_i32, %arg1, %c0_i32_0 : i32, i32, i32, i32
  }
}

</mosaic_0001>

<bundles_post_ra>
// kernel: tpu_custom_call.1
= control target key start
LH: loop header
LB: loop body
LE: loop exit
PB: predicated region body
PF: predicated region fallthrough
CT: control target
= control target key end

     0   :  { %6 = vsyncpa [#allocation3], 0  ;;  %s341_s0 = inlined_call_operand.hbm [shape: f32[8,128], index: 0, kind: input, shape index: {}]   ;;  %s342_s1 = inlined_call_operand.hbm [shape: f32[8,128], index: 1, kind: output, shape index: {}]  }
   0x1   :  { %7 = vsyncpa [#allocation4], 0  ;;  %s262_s6 = smov 0  }
   0x2 LB: > { %s145_s7 = sadd.s32 4294967295, %s248_s6   ;;  %p146_p0 = scmp.ge.s32.totalorder %s248_s6, 1  ;;  %s248_s6 = sphi %s262_s6, %s13_s6  }
   0x3   : > { %p60_p1 = scmp.lt.s32.totalorder %s248_s6, 3  ;;  %p276_p3 = scmp.eq.s32.totalorder %s145_s7, 0 }
   0x4   : > { %s250_s10 = smov [#allocation2]   ;;  %s180_s15 = scalar_lea.hbm %s341_s0, 128 }
   0x5   : > { %p270_p2 = pnand %p146_p0, %p60_p1  ;;  %s73_s11 = sshll.u32 %s250_s10, 4  ;;  %s74_s11 = int_to_ptr.vmem [resolvable:$true] %s73_s11 }
   0x6   : > { %s347_s9 = scalar_select %p276_p3, 1, 0 }
   0x7   : > { %s346_s8 = scalar_select %p270_p2, 1, 0 }
   0x8   : > { %p162_p4 = pneg %p270_p2  ;;  %p181_p6 = scmp.ne.s32.totalorder %s341_s0, %s180_s15 }
   0x9   : > { %p187_p10 = scmp.lt.u32.totalorder %s180_s15, %s341_s0 }
   0xa   : > { %p284_p5 = pnand %p276_p3, %p162_p4 }
   0xc   : > { %p182_p7 = pneg %p284_p5 }
   0xe   : > { %p183_p8 = pnand %p182_p7, %p181_p6 }
  0x10   : > { %p184_p9 = pneg %p183_p8 }
  0x12   : > { %p189_p11 = pnand %p187_p10, %p184_p9 }
  0x14   : > { %192 = shalt.err (!%p189_p11)
}
  0x15   : > { %s193_s20 = scalar_lea.vmem %s74_s11, 128  ;;  %p201_p1 = scmp.lt.s32.totalorder %s74_s11, %s74_s11 }
  0x16   : > { %p194_p12 = scmp.ne.s32.totalorder %s74_s11, %s193_s20  ;;  %p202_p4 = scmp.lt.s32.totalorder %s193_s20, %s193_s20 }
  0x18   : > { %p196_p13 = pnand %p194_p12, %p182_p7  ;;  %p203_p3 = por %p202_p4, %p201_p1 }
  0x1a   : > { %p197_p0 = pneg %p196_p13 }
  0x1c   : > { %p204_p2 = pnand %p203_p3, %p197_p0 }
  0x1e   : > { %207 = shalt.err (!%p204_p2)
}
  0x1f   : > { %165 = dma.hbm_to_vmem [thread:$0]  (!%p284_p5), %s341_s0, 128, %s74_s11, [#allocation3]  }
  0x20   : > { %p349_p6 = scmp.ne.s32.totalorder %s346_s8, 0 }
  0x21   : > { %p350_p8 = scmp.ne.s32.totalorder (!%p349_p6), %s347_s9, 0 }
  0x22   : > { %86 = sbr.rel (%p349_p6) target bundleno = 67 (0x43), region = 24 }
  0x29   : > { %239 = dma.done.wait (%p350_p8), [#allocation3], 128  }
  0x2a   : > { %241 = vsyncadd (%p350_p8), [#allocation3], 4294967168  ;;  %s251_s23 = smov [#allocation5]   ;;  %v96_v0 = vld [vmem:[#allocation2] sm:$0xff]  ;;  %p312_p2 = scmp.eq.s32.totalorder %s145_s7, 1 }
  0x2b   : > { %s106_s24 = sshll.u32 %s251_s23, 4  ;;  %v97_v1 = vadd.f32 1.0, %v96_v0  ;;  %s107_s24 = int_to_ptr.vmem [resolvable:$true] %s106_s24 }
  0x2c   : > { %s208_s26 = scalar_lea.vmem %s107_s24, 128  ;;  %p215_p9 = scmp.lt.s32.totalorder %s107_s24, %s107_s24 }
  0x2d   : > { %98 = vst [vmem:[#allocation5] sm:$0xff] %v97_v1  ;;  %p209_p3 = scmp.ne.s32.totalorder %s107_s24, %s208_s26  ;;  %p216_p10 = scmp.lt.s32.totalorder %s208_s26, %s208_s26 }
  0x2f   : > { %p210_p5 = pnand %p209_p3, %p312_p2  ;;  %p217_p11 = por %p216_p10, %p215_p9 }
  0x31   : > { %p211_p7 = pneg %p210_p5 }
  0x33   : > { %p218_p12 = pnand %p217_p11, %p211_p7 }
  0x35   : > { %221 = shalt.err (!%p218_p12)
}
  0x36   : > { %s222_s29 = scalar_lea.hbm %s342_s1, 128 }
  0x37   : > { %p223_p13 = scmp.ne.s32.totalorder %s342_s1, %s222_s29  ;;  %p228_p4 = scmp.lt.u32.totalorder %s222_s29, %s342_s1 }
  0x39   : > { %p224_p0 = pnand %p223_p13, %p312_p2 }
  0x3b   : > { %p225_p1 = pneg %p224_p0 }
  0x3d   : > { %p230_p6 = pnand %p228_p4, %p225_p1 }
  0x3f   : > { %233 = shalt.err (!%p230_p6)
}
  0x40   : > { %159 = dma.vmem_to_hbm [thread:$0]  (%p312_p2), %s107_s24, 128, %s342_s1, [#allocation4]  }
  0x41   : > { %243 = dma.done.wait (%p312_p2), [#allocation4], 128  }
  0x42   : > { %245 = vsyncadd (%p312_p2), [#allocation4], 4294967168 }
  0x43 PF: > { %s13_s6 = sadd.s32 1, %s248_s6  }
  0x44   : > { %p10_p8 = scmp.ge.s32.totalorder %s13_s6, 4  }
  0x46   :  { %12 = sbr.rel (!%p10_p8) target bundleno = 2 (0x2), region = 53 }
  0x4d   :  { %119 = vsyncpa [#allocation3], 1 }
  0x4e   :  { %121 = vsyncpa [#allocation3 + $0x1], 1 }
  0x4f   :  { %122 = vsyncpa [#allocation4], 1 }
  0x50   :  { %124 = vsyncpa [#allocation4 + $0x1], 1 }

// kernel: tpu_custom_call.1
= control target key start
LH: loop header
LB: loop body
LE: loop exit
PB: predicated region body
PF: predicated region fallthrough
CT: control target
= control target key end

     0   :  { %s1970_s0 = inlined_call_operand.hbm [shape: f32[2,8,32], index: 0, kind: input, shape index: {}]   ;;  %s1971_s1 = inlined_call_operand.hbm [shape: f32[32,32], index: 1, kind: input, shape index: {}]   ;;  %s1972_s2 = inlined_call_operand.hbm [shape: f32[32,32], index: 2, kind: input, shape index: {}]   ;;  %s1973_s3 = inlined_call_operand.hbm [shape: f32[32,32], index: 3, kind: input, shape index: {}]   ;;  %s1974_s4 = inlined_call_operand.vmem [shape: f32[1,32], index: 4, kind: input, shape index: {}]   ;;  %s1975_s5 = inlined_call_operand.vmem [shape: f32[1,32], index: 5, kind: input, shape index: {}]   ;;  %s1976_s6 = inlined_call_operand.vmem [shape: f32[1,32], index: 6, kind: input, shape index: {}]   ;;  %s1977_s7 = inlined_call_operand.hbm [shape: bf16[2,4,8,8], index: 7, kind: output, shape index: {0}]   ;;  %s1978_s8 = inlined_call_operand.hbm [shape: bf16[2,4,8,8], index: 8, kind: output, shape index: {1}]   ;;  %s1979_s9 = inlined_call_operand.hbm [shape: bf16[2,4,8,8], index: 9, kind: output, shape index: {2}]  }
   0x1   :  { %1993 = sst [smem:[#allocation21_spill]] %s1970_s0 }
   0x2   :  { %1994 = sst [smem:[#allocation22_spill]] %s1977_s7 }
   0x3   :  { %1995 = sst [smem:[#allocation23_spill]] %s1978_s8 }
   0x4   :  { %1996 = sst [smem:[#allocation24_spill]] %s1979_s9 }
   0x5   :  { %15 = vsyncpa [#allocation3], 0 }
   0x6   :  { %17 = vsyncpa [#allocation3 + $0x1], 0 }
   0x7   :  { %18 = vsyncpa [#allocation6], 0 }
   0x8   :  { %19 = vsyncpa [#allocation9], 0 }
   0x9   :  { %20 = vsyncpa [#allocation4], 0 }
   0xa   :  { %22 = vsyncpa [#allocation4 + $0x1], 0 }
   0xb   :  { %23 = vsyncpa [#allocation12], 0 }
   0xc   :  { %25 = vsyncpa [#allocation12 + $0x1], 0  ;;  %s1562_s30 = smov 0   ;;  %s1564_s10 = smov 0  }
   0xd   :  { %s1566_s11 = smov 0   ;;  %s1568_s12 = smov 0  }
   0xe   :  { %s1570_s13 = smov 0   ;;  %s1572_s14 = smov 0  }
   0xf LB: > { %1997 = sst [smem:[#allocation19_spill]] %s1473_s30  ;;  %s1593_s15 = sadd.s32 4294967295, %s1493_s14   ;;  %s1493_s14 = sphi %s1572_s14, %s31_s14   ;;  %s1489_s13 = sphi %s1570_s13, %s2029_s13   ;;  %s1485_s12 = sphi %s1568_s12, %s2028_s12   ;;  %s1481_s11 = sphi %s1566_s11, %s2027_s11   ;;  %s1477_s10 = sphi %s1564_s10, %s2026_s10   ;;  %s1473_s30 = sphi %s1562_s30, %s2025_s30  }
  0x10   : > { %s1980_s16 = sadd.s32 4294967294, %s1493_s14   ;;  %p65_p0 = scmp.ne.s32.totalorder %s1477_s10, %s1473_s30 }
  0x11   : > { %p1982_p1 = scmp.eq.s32.totalorder %s1593_s15, 0  ;;  %p223_p3 = scmp.eq.s32.totalorder %s1980_s16, 1 }
  0x12   : > { %p1002_p5 = scmp.ge.s32.totalorder %s1493_s14, 1  ;;  %p286_p7 = scmp.lt.s32.totalorder %s1493_s14, 3 }
  0x13   : > { %p1604_p4 = por %p1982_p1, %p65_p0  ;;  %p1609_p6 = por %p223_p3, %p65_p0 }
  0x14   : > { %p1614_p8 = pnand %p1002_p5, %p286_p7  ;;  %s1495_s20 = smov [#allocation5]  }
  0x15   : > { %s1998_s17 = scalar_select %p1604_p4, 1, 0 }
  0x16   : > { %s1999_s18 = scalar_select %p1609_p6, 1, 0 }
  0x17   : > { %s2001_s19 = scalar_select %p1614_p8, 1, 0 }
  0x18   : > { %2000 = sst [smem:[#allocation20_spill]] %s1999_s18  ;;  %s298_s21 = sshll.u32 %s1495_s20, 4  ;;  %s1618_s21 = int_to_ptr.vmem [resolvable:$true] %s298_s21 }
  0x19   : > { %p1136_p9 = pneg %p1614_p8  ;;  %s1496_s23 = smov [#allocation7]  }
  0x1a   : > { %s311_s24 = sshll.u32 %s1496_s23, 4  ;;  %s1497_s25 = smov [#allocation8]   ;;  %s1629_s24 = int_to_ptr.vmem [resolvable:$true] %s311_s24 }
  0x1b   : > { %p1625_p11 = pnand %p1136_p9, %p1982_p1  ;;  %s1631_s26 = sshll.u32 %s1497_s25, 4  ;;  %s325_s26 = int_to_ptr.vmem [resolvable:$true] %s1631_s26 }
  0x1c   : > { %s1229_s29 = scalar_lea.hbm %s1971_s1, 512 }
  0x1d   : > { %p1230_p12 = scmp.ne.s32.totalorder %s1971_s1, %s1229_s29  ;;  %p1641_p13 = pneg %p1625_p11 }
  0x1e   : > { %p1236_p5 = scmp.lt.u32.totalorder %s1229_s29, %s1971_s1 }
  0x1f   : > { %p1232_p0 = pnand %p1641_p13, %p1230_p12 }
  0x21   : > { %p1233_p3 = pneg %p1232_p0 }
  0x23   : > { %p1238_p7 = pnand %p1236_p5, %p1233_p3 }
  0x25   : > { %1241 = shalt.err (!%p1238_p7)
}
  0x26   : > { %s1242_s16 = scalar_lea.vmem %s1618_s21, 512  ;;  %p1250_p2 = scmp.lt.s32.totalorder %s1618_s21, %s1618_s21 }
  0x27   : > { %p1243_p9 = scmp.ne.s32.totalorder %s1618_s21, %s1242_s16  ;;  %p1251_p6 = scmp.lt.s32.totalorder %s1242_s16, %s1242_s16 }
  0x29   : > { %p1245_p10 = pnand %p1243_p9, %p1641_p13  ;;  %p1252_p12 = por %p1251_p6, %p1250_p2 }
  0x2b   : > { %p1246_p1 = pneg %p1245_p10 }
  0x2d   : > { %p1253_p0 = pnand %p1252_p12, %p1246_p1 }
  0x2f   : > { %1256 = shalt.err (!%p1253_p0)
}
  0x30   : > { %s1498_s27 = smov 128   ;;  %s1499_s28 = smov 8  }
  0x31   : > { %1139 = dma.hbm_to_vmem [thread:$0]  (!%p1625_p11), %s1971_s1, 512, %s1618_s21, [#allocation6], %s1498_s27, %s1498_s27, %s1499_s28  }
  0x32   : > { %s1257_s16 = scalar_lea.hbm %s1972_s2, 512 }
  0x33   : > { %p1258_p1 = scmp.ne.s32.totalorder %s1972_s2, %s1257_s16  ;;  %p1264_p10 = scmp.lt.u32.totalorder %s1257_s16, %s1972_s2 }
  0x35   : > { %p1260_p2 = pnand %p1258_p1, %p1641_p13 }
  0x37   : > { %p1261_p6 = pneg %p1260_p2 }
  0x39   : > { %p1266_p3 = pnand %p1264_p10, %p1261_p6 }
  0x3b   : > { %1269 = shalt.err (!%p1266_p3)
}
  0x3c   : > { %s1270_s21 = scalar_lea.vmem %s1629_s24, 512  ;;  %p1278_p12 = scmp.lt.s32.totalorder %s1629_s24, %s1629_s24 }
  0x3d   : > { %p1271_p5 = scmp.ne.s32.totalorder %s1629_s24, %s1270_s21  ;;  %p1279_p0 = scmp.lt.s32.totalorder %s1270_s21, %s1270_s21 }
  0x3f   : > { %p1273_p7 = pnand %p1271_p5, %p1641_p13  ;;  %p1280_p1 = por %p1279_p0, %p1278_p12 }
  0x41   : > { %p1274_p9 = pneg %p1273_p7 }
  0x43   : > { %p1281_p2 = pnand %p1280_p1, %p1274_p9 }
  0x45   : > { %1284 = shalt.err (!%p1281_p2)
}
  0x46   : > { %1142 = dma.hbm_to_vmem [thread:$0]  (!%p1625_p11), %s1972_s2, 512, %s1629_s24, [#allocation6], %s1498_s27, %s1498_s27, %s1499_s28  }
  0x47   : > { %s1285_s29 = scalar_lea.hbm %s1973_s3, 512 }
  0x48   : > { %p1286_p6 = scmp.ne.s32.totalorder %s1973_s3, %s1285_s29  ;;  %p1292_p5 = scmp.lt.u32.totalorder %s1285_s29, %s1973_s3 }
  0x4a   : > { %p1288_p10 = pnand %p1286_p6, %p1641_p13 }
  0x4c   : > { %p1289_p3 = pneg %p1288_p10 }
  0x4e   : > { %p1294_p7 = pnand %p1292_p5, %p1289_p3 }
  0x50   : > { %1297 = shalt.err (!%p1294_p7)
}
  0x51   : > { %s1298_s21 = scalar_lea.vmem %s325_s26, 512  ;;  %p1306_p1 = scmp.lt.s32.totalorder %s325_s26, %s325_s26 }
  0x52   : > { %p1299_p9 = scmp.ne.s32.totalorder %s325_s26, %s1298_s21  ;;  %p1307_p2 = scmp.lt.s32.totalorder %s1298_s21, %s1298_s21 }
  0x54   : > { %p1301_p12 = pnand %p1299_p9, %p1641_p13  ;;  %p1308_p4 = por %p1307_p2, %p1306_p1 }
  0x56   : > { %p1302_p0 = pneg %p1301_p12 }
  0x58   : > { %p1309_p8 = pnand %p1308_p4, %p1302_p0 }
  0x5a   : > { %1312 = shalt.err (!%p1309_p8)
}
  0x5b   : > { %1145 = dma.hbm_to_vmem [thread:$0]  (!%p1625_p11), %s1973_s3, 512, %s325_s26, [#allocation9], %s1498_s27, %s1498_s27, %s1499_s28  }
  0x5c   : > { %s52_s18 = sadd.s32 1, %s1481_s11  ;;  %s43_s22 = sadd.s32 1, %s1489_s13 }
  0x5d   : > { %p59_p4 = scmp.ne.s32.totalorder %s1481_s11, %s1477_s10  ;;  %p45_p8 = scmp.ge.s32.totalorder %s43_s22, 2 }
  0x5e   : > { %p60_p13 = scmp.eq.s32.totalorder %s1493_s14, 0  ;;  %p2004_p6 = scmp.eq.s32.totalorder %s1593_s15, 1 }
  0x5f   : > { %p1163_p3 = scmp.lt.s32.totalorder %s1493_s14, 2  ;;  %s2031_s22 = smov (%p45_p8, %s43_s22), 0 }
  0x60   : > { %p1720_p10 = por %p2004_p6, %p59_p4  ;;  %p61_p5 = por %p60_p13, %p59_p4 }
  0x61   : > { %s347_s9 = sand.u32 1, %s1481_s11   ;;  %s47_s30 = ssub.s32 %s1489_s13, %s2031_s22 }
  0x62   : > { %p50_p7 = scmp.eq.s32.totalorder %s47_s30, 0  ;;  %s1007_s26 = sshll.u32 %s347_s9, 3 }
  0x63   : > { %s1008_s27 = sshll.u32 %s1489_s13, 7  ;;  %s2006_s0 = sld [smem:[#allocation21_spill]] }
  0x64   : > { %s1732_s28 = scalar_select %p50_p7, %s1481_s11, %s52_s18  }
  0x65   : > { %s351_s25 = scalar_lea.vmem [#allocation2], %s1007_s26  ;;  %p1743_p11 = pnand %p1163_p3, %p61_p5 }
  0x66   : > { %s359_s16 = sshll.u32 %s351_s25, 4  ;;  %s348_s24 = scalar_lea.sflag [#allocation3], %s347_s9  ;;  %s1739_s16 = int_to_ptr.vmem [resolvable:$true] %s359_s16 }
  0x67   : > { %p1315_p12 = pneg %p1743_p11 }
  0x69   : > { %s1737_s23 = scalar_lea.hbm %s2006_s0, %s1008_s27  ;;  %s1318_s26 = scalar_lea.hbm %s2006_s0, 256 }
  0x6a   : > { %s1313_s7 = scalar_lea.hbm %s1737_s23, 128  ;;  %p1319_p2 = scmp.lt.u32.totalorder %s1737_s23, %s2006_s0 }
  0x6b   : > { %p1314_p9 = scmp.ne.s32.totalorder %s1737_s23, %s1313_s7  ;;  %p1320_p4 = scmp.lt.u32.totalorder %s1318_s26, %s1313_s7 }
  0x6c   : > { %p1322_p13 = scmp.lt.u32.totalorder %s1313_s7, %s1737_s23 }
  0x6d   : > { %p1316_p0 = pnand %p1315_p12, %p1314_p9  ;;  %p1321_p8 = por %p1320_p4, %p1319_p2 }
  0x6f   : > { %p1317_p1 = pneg %p1316_p0  ;;  %p1323_p6 = por %p1322_p13, %p1321_p8 }
  0x71   : > { %p1324_p3 = pnand %p1323_p6, %p1317_p1 }
  0x73   : > { %1327 = shalt.err (!%p1324_p3)
}
  0x74   : > { %s1328_s9 = scalar_lea.vmem %s1739_s16, 128  ;;  %s1500_s20 = smov [#allocation2]  }
  0x75   : > { %p1329_p5 = scmp.ne.s32.totalorder %s1739_s16, %s1328_s9  ;;  %s1333_s25 = sshll.u32 %s1500_s20, 4  ;;  %s1334_s25 = int_to_ptr.vmem [resolvable:$false] %s1333_s25 }
  0x76   : > { %s1335_s18 = scalar_lea.vmem %s1334_s25, 256  ;;  %p1336_p0 = scmp.lt.s32.totalorder %s1739_s16, %s1334_s25 }
  0x77   : > { %p1331_p7 = pnand %p1329_p5, %p1315_p12  ;;  %p1337_p2 = scmp.lt.s32.totalorder %s1335_s18, %s1328_s9 }
  0x79   : > { %p1332_p9 = pneg %p1331_p7  ;;  %p1338_p4 = por %p1337_p2, %p1336_p0 }
  0x7b   : > { %p1339_p8 = pnand %p1338_p4, %p1332_p9 }
  0x7d   : > { %1342 = shalt.err (!%p1339_p8)
}
  0x7e   : > { %1149 = dma.hbm_to_vmem [thread:$0]  (!%p1743_p11), %s1737_s23, 128, %s1739_s16, %s348_s24  }
  0x7f   : > { %p2008_p1 = scmp.ne.s32.totalorder %s2001_s19, 0 }
  0x80   : > { %s1775_s7 = sand.u32 (!%p2008_p1), 1, %s1477_s10   ;;  %p2009_p12 = scmp.ne.s32.totalorder (!%p2008_p1), %s1998_s17, 0 }
  0x81   : > { %368 = sbr.rel (%p2008_p1) target bundleno = 587 (0x24b), region = 48  ;;  %s1010_s30 = sshll.u32 (!%p2008_p1), %s1775_s7, 3 }
  0x82   : > { %s371_s26 = scalar_lea.sflag (!%p2008_p1), [#allocation3], %s1775_s7  ;;  %s1779_s27 = scalar_lea.vmem (!%p2008_p1), [#allocation2], %s1010_s30 }
  0x88   : > { %1452 = dma.done.wait (%p2009_p12), %s371_s26, 128  }
  0x89   : > { %1454 = vsyncadd (%p2009_p12), %s371_s26, 4294967168  ;;  %p2010_p11 = scmp.eq.s32.totalorder %s1593_s15, 0 }
  0x8b   : > { %1456 = dma.done.wait (%p2010_p11), [#allocation6], 1024   ;;  %p2011_p13 = pmov %p2010_p11 }
  0x8c   : > { %p2012_p6 = pmov %p2010_p11 }
  0x8d   : > { %1458 = vsyncadd (%p2011_p13), [#allocation6], 4294966272 }
  0x8e   : > { %1460 = dma.done.wait (%p2012_p6), [#allocation9], 512   ;;  %p2013_p3 = pmov %p2012_p6 }
  0x8f   : > { %v1501_v0 = vmov 0.0|0.0   ;;  %vm1502_vm0 = vmmov 0   ;;  %v1503_v1 = vmov 0.0   ;;  %v432_v2 = vld [vmem:[#allocation5] sm:$0xff]  ;;  %v433_v3 = vld [vmem:[#allocation5 + $0x8] sm:$0xff]  ;;  %v434_v4 = vld [vmem:[#allocation5 + $0x10] sm:$0xff] }
  0x90   : > { %1462 = vsyncadd (%p2013_p3), [#allocation9], 4294966784  ;;  %1098 = vmatprep.subr.bf16.mxu0 %v1501_v0  ;;  %1073 = vmatprep.mubr.msk.f32.mxu0 %vm1502_vm0, %v1503_v1  ;;  %v1099_v5 = vpack.c.bf16 %v433_v3, %v432_v2  ;;  %v435_v6 = vld [vmem:[#allocation5 + $0x18] sm:$0xff]  ;;  %v517_v8 = vld [vmem:[#allocation7] sm:$0xff]  ;;  %vm443_vm1 = vcmask 261120   ;;  %s1798_s17 = sshll.u32 %s1775_s7, 4 }
  0x91   : > { %1104 = vmatprep.subr.bf16.mxu1 %v1501_v0  ;;  %1084 = vmatprep.mubr.msk.f32.mxu1 %vm1502_vm0, %v1503_v1  ;;  %v1102_v7 = vpack.c.bf16 %v435_v6, %v434_v4  ;;  %v518_v9 = vld [vmem:[#allocation7 + $0x8] sm:$0xff]  ;;  %v519_v10 = vld [vmem:[#allocation7 + $0x10] sm:$0xff]  ;;  %v598_v11 = vld [vmem:[#allocation8] sm:$0xff]  ;;  %vm712_vm2 = vcmask 60416   ;;  %s1804_s16 = scalar_lea.vmem [#allocation10], %s1798_s17  ;;  %s1504_s21 = smov 112  }
  0x92   : > { %1100 = vmatpush3.bf16.msra.mxu0 %v1099_v5  ;;  %v599_v12 = vld [vmem:[#allocation8 + $0x8] sm:$0xff]  ;;  %v1105_v13 = vpack.c.bf16 %v518_v9, %v517_v8  ;;  %v520_v14 = vld [vmem:[#allocation7 + $0x18] sm:$0xff]  ;;  %v600_v18 = vld [vmem:[#allocation8 + $0x10] sm:$0xff]  ;;  %s1505_s24 = smov 120   ;;  %s1506_s20 = smov 104  }
  0x93   : > { %1101 = vmatprep.subr.bf16.mxu0 %v1501_v0  ;;  %v1108_v15 = vpack.c.bf16 %v520_v14, %v519_v10  ;;  %v431_v16 = vld [vmem:[%s1779_s27] sm:$0xff]  ;;  %v1111_v17 = vpack.c.bf16 %v599_v12, %v598_v11  ;;  %s1812_s25 = scalar_lea.vmem [#allocation13], %s1798_s17  ;;  %s788_s26 = sshll.u32 %s1804_s16, 4  ;;  %s1823_s26 = int_to_ptr.vmem [resolvable:$true] %s788_s26 }
  0x94   : > { %1106 = vmatpush3.bf16.msra.mxu1 %v1105_v13  ;;  %v601_v19 = vld [vmem:[#allocation8 + $0x18] sm:$0xff]  ;;  %v1017_v21 = vld [vmem:[%s1974_s4] ss:$0 sm:$0xff]  ;;  %s1821_s27 = sshll.u32 %s1485_s12, 8  ;;  %s764_s12 = scalar_lea.sflag [#allocation4], %s1775_s7 }
  0x95   : > { %1107 = vmatprep.subr.bf16.mxu1 %v1501_v0  ;;  %v1114_v20 = vpack.c.bf16 %v601_v19, %v600_v18  ;;  %v1021_v28 = vld [vmem:[%s1976_s6] ss:$0 sm:$0xff]  ;;  %s1343_s29 = scalar_lea.vmem %s1823_s26, 256  ;;  %s1507_s9 = smov [#allocation10]  }
  0x96   : > { %1103 = vmatpush3.bf16.msra.mxu0 %v1102_v7  ;;  %v1019_v33 = vld [vmem:[%s1975_s5] ss:$0 sm:$0xff]  ;;  %p1344_p5 = scmp.ne.s32.totalorder %s1823_s26, %s1343_s29 }
  0x97   : > { %1110 = vmatprep.subr.bf16.mxu0 %v1501_v0 }
  0x98   : > { %1109 = vmatpush3.bf16.msra.mxu1 %v1108_v15  ;;  %p1345_p7 = pnand %p1344_p5, %p1720_p10 }
  0x99   : > { %1074 = vmatmul.mubr.msk.f32.vlgmr.msra.gmra.mrb[0].mxu0 %vm443_vm1, %v431_v16 }
  0x9a   : > { %1112 = vmatpush3.bf16.msra.mxu0 %v1111_v17  ;;  %1095 = vmatprep.mubr.msk.f32.mxu0 %vm1502_vm0, %v1503_v1  ;;  %p1346_p9 = pneg %p1345_p7 }
  0x9b   : > { %1113 = vmatprep.subr.bf16.mxu0 %v1501_v0  ;;  %1085 = vmatmul.mubr.msk.f32.vlgmr.msra.gmra.mrb[0].mxu1 %vm443_vm1, %v431_v16 }
  0x9e   : > { %1115 = vmatpush3.bf16.msra.mxu0 %v1114_v20 }
  0xa1   : > { %1096 = vmatmul.mubr.msk.f32.vlgmr.msra.gmra.mrb[2].mxu0 %vm443_vm1, %v431_v16 }
 0x16c   : > { %v513_v22 = vpop.f32.mrb[0].mxu0 }
 0x16d   : > { %v514_v23 = vadd.f32 %v1017_v21, %v513_v22  ;;  %v1075_v24 = vpop.f32.mrb[1].mxu0 }
 0x16e   : > { %v594_v26 = vpop.f32.mrb[0].mxu1 }
 0x16f   : > { %v711_v25 = vpack.c.bf16 %v514_v23, %v514_v23  ;;  %v1086_v27 = vpop.f32.mrb[1].mxu1  ;;  %v595_v34 = vadd.f32 %v1019_v33, %v594_v26 }
 0x171   : > { %713 = vst.msk [vmem:[%s1804_s16] sm:$0xf] %vm712_vm2, %v711_v25  ;;  %737 = vrot.lane.b32.xlu1 %v711_v25, %s1504_s21  ;;  %721 = vrot.lane.b32.xlu0 %v711_v25, %s1505_s24 }
 0x174   : > { %v675_v29 = vpop.f32.mrb[2].mxu0 }
 0x175   : > { %v676_v30 = vadd.f32 %v1021_v28, %v675_v29  ;;  %750 = vrot.lane.b32.xlu0 %v711_v25, %s1506_s20  ;;  %v1097_v31 = vpop.f32.mrb[3].mxu0 }
 0x177   : > { %v714_v32 = vpack.c.bf16 %v676_v30, %v676_v30 }
 0x179   : > { %715 = vst.msk [vmem:[%s1812_s25] sm:$0xf] %vm712_vm2, %v714_v32  ;;  %742 = vrot.lane.b32.xlu1 %v714_v32, %s1504_s21  ;;  %729 = vrot.lane.b32.xlu0 %v714_v32, %s1505_s24  ;;  %s2014_s21 = sld [smem:[#allocation22_spill]] }
 0x17d   : > { %755 = vrot.lane.b32.xlu1 %v714_v32, %s1506_s20  ;;  %s1347_s20 = sshll.u32 %s1507_s9, 4  ;;  %s1348_s20 = int_to_ptr.vmem [resolvable:$false] %s1347_s20 }
 0x17e   : > { %s1349_s18 = scalar_lea.vmem %s1348_s20, 512  ;;  %p1350_p0 = scmp.lt.s32.totalorder %s1823_s26, %s1348_s20 }
 0x17f   : > { %s1833_s24 = scalar_lea.hbm %s2014_s21, %s1821_s27  ;;  %p1351_p2 = scmp.lt.s32.totalorder %s1349_s18, %s1343_s29 }
 0x181   : > { %p1352_p4 = por %p1351_p2, %p1350_p0 }
 0x183   : > { %p1353_p8 = pnand %p1352_p4, %p1346_p9 }
 0x197   : > { %679 = vxpose.xlu0.b32.start.end [1/1] (short) (narrow) %v595_v34, 32 }
 0x1e3   : > { %v738_v35 = vpop.permute.xlu1 %737  ;;  %v722_v36 = vpop.permute.xlu0 %721 }
 0x1e4   : > { %1028 = vst.msk [vmem:[%s1804_s16 + $0x8] sm:$0xf] %vm712_vm2, %v738_v35  ;;  %1024 = vst.msk [vmem:[%s1804_s16 + $0x4] sm:$0xf] %vm712_vm2, %v722_v36 }
 0x1e7   : > { %v751_v37 = vpop.permute.xlu0 %750 }
 0x1e8   : > { %1031 = vst.msk [vmem:[%s1804_s16 + $0xc] sm:$0xf] %vm712_vm2, %v751_v37 }
 0x1e9   : > { %1356 = shalt.err (!%p1353_p8)
}
 0x1ea   : > { %s1357_s16 = scalar_lea.hbm %s1833_s24, 256  ;;  %s1361_s23 = scalar_lea.hbm %s2014_s21, 512 }
 0x1eb   : > { %p1358_p1 = scmp.ne.s32.totalorder %s1833_s24, %s1357_s16  ;;  %p1362_p13 = scmp.lt.u32.totalorder %s1833_s24, %s2014_s21 }
 0x1ec   : > { %p1363_p6 = scmp.lt.u32.totalorder %s1361_s23, %s1357_s16  ;;  %p1365_p5 = scmp.lt.u32.totalorder %s1357_s16, %s1833_s24 }
 0x1ed   : > { %p1359_p12 = pnand %p1358_p1, %p1720_p10 }
 0x1ee   : > { %p1364_p3 = por %p1363_p6, %p1362_p13 }
 0x1ef   : > { %p1360_p11 = pneg %p1359_p12 }
 0x1f0   : > { %p1366_p7 = por %p1365_p5, %p1364_p3 }
 0x1f2   : > { %p1367_p9 = pnand %p1366_p7, %p1360_p11 }
 0x1f4   : > { %1370 = shalt.err (!%p1367_p9)
}
 0x1f5   : > { %s1989_s29 = smov 64   ;;  %s1991_s18 = smov 4   ;;  %v743_v38 = vpop.permute.xlu1 %742  ;;  %v730_v39 = vpop.permute.xlu0 %729 }
 0x1f6   : > { %1130 = dma.vmem_to_hbm [thread:$0]  (%p1720_p10), %s1823_s26, 256, %s1833_s24, %s764_s12, %s1989_s29, %s1989_s29, %s1991_s18  }
 0x1f7   : > { %1029 = vst.msk [vmem:[%s1812_s25 + $0x8] sm:$0xf] %vm712_vm2, %v743_v38  ;;  %1026 = vst.msk [vmem:[%s1812_s25 + $0x4] sm:$0xf] %vm712_vm2, %v730_v39  ;;  %s423_s16 = scalar_lea.vmem [#allocation11], %s1798_s17  ;;  %s768_s26 = sand.u32 1, %s1593_s15  }
 0x1f8   : > { %s805_s7 = sshll.u32 %s423_s16, 4  ;;  %s822_s24 = sshll.u32 %s1812_s25, 4  ;;  %s1876_s7 = int_to_ptr.vmem [resolvable:$true] %s805_s7  ;;  %s1884_s24 = int_to_ptr.vmem [resolvable:$true] %s822_s24 }
 0x1f9   : > { %v756_v40 = vpop.permute.xlu1 %755  ;;  %s2015_s30 = sld [smem:[#allocation23_spill]]  ;;  %s2017_s15 = sld [smem:[#allocation24_spill]] }
 0x1fa   : > { %1032 = vst.msk [vmem:[%s1812_s25 + $0xc] sm:$0xf] %vm712_vm2, %v756_v40  ;;  %s1893_s29 = scalar_lea.sflag [#allocation12], %s768_s26  ;;  %s1371_s18 = scalar_lea.vmem %s1876_s7, 256 }
 0x1fb   : > { %p1372_p0 = scmp.ne.s32.totalorder %s1876_s7, %s1371_s18  ;;  %s1510_s0 = smov [#allocation11]  }
 0x1fc   : > { %s1375_s17 = sshll.u32 %s1510_s0, 4  ;;  %s1376_s17 = int_to_ptr.vmem [resolvable:$false] %s1375_s17 }
 0x1fd   : > { %p1373_p2 = pnand %p1372_p0, %p1720_p10  ;;  %s1377_s12 = scalar_lea.vmem %s1376_s17, 512 }
 0x1fe   : > { %p1378_p8 = scmp.lt.s32.totalorder %s1876_s7, %s1376_s17  ;;  %p1379_p1 = scmp.lt.s32.totalorder %s1377_s12, %s1371_s18 }
 0x1ff   : > { %s2016_s19 = smov %s2015_s30  ;;  %s1882_s23 = scalar_lea.hbm %s2015_s30, %s1821_s27 }
 0x200   : > { %s1890_s25 = scalar_lea.hbm %s2017_s15, %s1821_s27  ;;  %p1374_p4 = pneg %p1373_p2 }
 0x201   : > { %p1380_p12 = por %p1379_p1, %p1378_p8 }
 0x203   : > { %p1381_p11 = pnand %p1380_p12, %p1374_p4 }
 0x217   : > { %v695_v41 = vpop.trf.xlu0 }
 0x218   : > { %v716_v42 = vpack.c.bf16 %v695_v41, %v695_v41 }
 0x21a   : > { %717 = vst.msk [vmem:[%s423_s16] sm:$0xf] %vm712_vm2, %v716_v42 }
 0x21b   : > { %v696_v43 = vpop.trf.xlu0 }
 0x21c   : > { %v734_v44 = vpack.c.bf16 %v696_v43, %v696_v43 }
 0x21e   : > { %1027 = vst.msk [vmem:[%s423_s16 + $0x4] sm:$0xf] %vm712_vm2, %v734_v44 }
 0x21f   : > { %v697_v45 = vpop.trf.xlu0 }
 0x220   : > { %v747_v46 = vpack.c.bf16 %v697_v45, %v697_v45 }
 0x222   : > { %1030 = vst.msk [vmem:[%s423_s16 + $0x8] sm:$0xf] %vm712_vm2, %v747_v46 }
 0x223   : > { %v698_v47 = vpop.trf.xlu0 }
 0x224   : > { %v760_v48 = vpack.c.bf16 %v698_v47, %v698_v47 }
 0x226   : > { %1033 = vst.msk [vmem:[%s423_s16 + $0xc] sm:$0xf] %vm712_vm2, %v760_v48 }
 0x227   : > { %1384 = shalt.err (!%p1381_p11)
}
 0x228   : > { %s1385_s27 = scalar_lea.hbm %s1882_s23, 256  ;;  %s1389_s0 = scalar_lea.hbm %s2016_s19, 512 }
 0x229   : > { %p1386_p13 = scmp.ne.s32.totalorder %s1882_s23, %s1385_s27  ;;  %p1390_p5 = scmp.lt.u32.totalorder %s1882_s23, %s2016_s19 }
 0x22a   : > { %p1391_p7 = scmp.lt.u32.totalorder %s1389_s0, %s1385_s27  ;;  %p1393_p0 = scmp.lt.u32.totalorder %s1385_s27, %s1882_s23 }
 0x22b   : > { %p1387_p6 = pnand %p1386_p13, %p1720_p10 }
 0x22c   : > { %p1392_p9 = por %p1391_p7, %p1390_p5 }
 0x22d   : > { %p1388_p3 = pneg %p1387_p6 }
 0x22e   : > { %p1394_p2 = por %p1393_p0, %p1392_p9 }
 0x230   : > { %p1395_p4 = pnand %p1394_p2, %p1388_p3 }
 0x232   : > { %1398 = shalt.err (!%p1395_p4)
}
 0x233   : > { %s2018_s18 = smov 4   ;;  %s2019_s20 = smov 64  }
 0x234   : > { %1131 = dma.vmem_to_hbm [thread:$0]  (%p1720_p10), %s1876_s7, 256, %s1882_s23, %s1893_s29, %s2019_s20, %s2019_s20, %s2018_s18  }
 0x235   : > { %s1399_s17 = scalar_lea.vmem %s1884_s24, 256  ;;  %s1511_s12 = smov [#allocation13]  }
 0x236   : > { %p1400_p8 = scmp.ne.s32.totalorder %s1884_s24, %s1399_s17  ;;  %s1403_s27 = sshll.u32 %s1511_s12, 4  ;;  %s1404_s27 = int_to_ptr.vmem [resolvable:$false] %s1403_s27 }
 0x237   : > { %s1405_s16 = scalar_lea.vmem %s1404_s27, 512  ;;  %p1406_p11 = scmp.lt.s32.totalorder %s1884_s24, %s1404_s27 }
 0x238   : > { %p1401_p1 = pnand %p1400_p8, %p1720_p10  ;;  %p1407_p13 = scmp.lt.s32.totalorder %s1405_s16, %s1399_s17 }
 0x23a   : > { %p1402_p12 = pneg %p1401_p1  ;;  %p1408_p6 = por %p1407_p13, %p1406_p11 }
 0x23c   : > { %p1409_p3 = pnand %p1408_p6, %p1402_p12 }
 0x23e   : > { %1412 = shalt.err (!%p1409_p3)
}
 0x23f   : > { %s1413_s7 = scalar_lea.hbm %s1890_s25, 256  ;;  %s1417_s0 = scalar_lea.hbm %s2017_s15, 512 }
 0x240   : > { %p1414_p5 = scmp.ne.s32.totalorder %s1890_s25, %s1413_s7  ;;  %p1418_p0 = scmp.lt.u32.totalorder %s1890_s25, %s2017_s15 }
 0x241   : > { %p1419_p2 = scmp.lt.u32.totalorder %s1417_s0, %s1413_s7  ;;  %p1421_p8 = scmp.lt.u32.totalorder %s1413_s7, %s1890_s25 }
 0x242   : > { %p1415_p7 = pnand %p1414_p5, %p1720_p10 }
 0x243   : > { %p1420_p4 = por %p1419_p2, %p1418_p0 }
 0x244   : > { %p1416_p9 = pneg %p1415_p7 }
 0x245   : > { %p1422_p1 = por %p1421_p8, %p1420_p4 }
 0x247   : > { %p1423_p12 = pnand %p1422_p1, %p1416_p9 }
 0x249   : > { %1426 = shalt.err (!%p1423_p12)
}
 0x24a   : > { %1132 = dma.vmem_to_hbm [thread:$0]  (%p1720_p10), %s1884_s24, 256, %s1890_s25, %s1893_s29, %s2019_s20, %s2019_s20, %s2018_s18  }
 0x24b PF: > { %s2020_s17 = sld [smem:[#allocation19_spill]]  ;;  %s2021_s12 = sld [smem:[#allocation20_spill]] }
 0x24c   : > { %p2023_p13 = scmp.ge.s32.totalorder %s1493_s14, 2 }
 0x251   : > { %s837_s27 = sand.u32 1, %s2020_s17   ;;  %p2022_p11 = scmp.ne.s32.totalorder %s2021_s12, 0 }
 0x252   : > { %s838_s16 = scalar_lea.sflag [#allocation4], %s837_s27 }
 0x253   : > { %p1151_p6 = pnand %p2023_p13, %p2022_p11 }
 0x255   : > { %1464 = dma.done.wait (!%p1151_p6), %s838_s16, 256  }
 0x256   : > { %1466 = vsyncadd (!%p1151_p6), %s838_s16, 4294967040  ;;  %s2024_s8 = sadd.s32 4294967294, %s1493_s14  }
 0x257   : > { %s846_s7 = sand.u32 1, %s2024_s8  }
 0x258   : > { %s847_s23 = scalar_lea.sflag [#allocation12], %s846_s7 }
 0x259   : > { %1468 = dma.done.wait (!%p1151_p6), %s847_s23, 512  }
 0x25a   : > { %1470 = vsyncadd (!%p1151_p6), %s847_s23, 4294966784  ;;  %s31_s14 = sadd.s32 1, %s1493_s14   ;;  %s2025_s30 = smov %s1477_s10 }
 0x25b   : > { %p28_p10 = scmp.ge.s32.totalorder %s31_s14, 4   ;;  %s2026_s10 = smov %s1481_s11 }
 0x25c   : > { %s2027_s11 = smov %s1732_s28  ;;  %s2028_s12 = smov %s1489_s13 }
 0x25d   : > { %s2029_s13 = smov %s2031_s22  ;;  %30 = sbr.rel (!%p28_p10) target bundleno = 15 (0xf), region = 146 }
 0x264   :  { %861 = vsyncpa [#allocation3], 1 }
 0x265   :  { %863 = vsyncpa [#allocation3 + $0x1], 1 }
 0x266   :  { %864 = vsyncpa [#allocation6], 1 }
 0x267   :  { %865 = vsyncpa [#allocation9], 1 }
 0x268   :  { %866 = vsyncpa [#allocation4], 1 }
 0x269   :  { %868 = vsyncpa [#allocation4 + $0x1], 1 }
 0x26a   :  { %869 = vsyncpa [#allocation12], 1 }
 0x26b   :  { %871 = vsyncpa [#allocation12 + $0x1], 1 }

</bundles_post_ra>
